<compile_context>
chip_gen: v7x
topology: tpu7x:2x2x1
jax: 0.10.0
libtpu: 0.0.40
codegen_flags: <defaults>
</compile_context>

<pallas_src>
import jax
import jax.numpy as jnp
from jax import lax
from jax.experimental import pallas as pl
from jax.experimental.pallas import tpu as pltpu


# --------------------------------------------------------------------------
# Kernels
# --------------------------------------------------------------------------
def _bn_row_kernel(ss_ref, x_ref, o_ref):
    # ss: (BR, 2) f32 [scale | shift] per row; x/o: (BR, BC) tiles.
    x = x_ref[...].astype(jnp.float32)
    scale = ss_ref[:, 0:1]
    shift = ss_ref[:, 1:2]
    o_ref[...] = (x * scale + shift).astype(o_ref.dtype)


def _bn_lane_kernel(ss_ref, x_ref, o_ref):
    # ss: (2, BC) f32 [scale ; shift] per lane; x/o: (BR, BC) tiles.
    x = x_ref[...].astype(jnp.float32)
    scale = ss_ref[0:1, :]
    shift = ss_ref[1:2, :]
    o_ref[...] = (x * scale + shift).astype(o_ref.dtype)


# --------------------------------------------------------------------------
# Tile-selection helpers
# --------------------------------------------------------------------------
def _round_up(x, m):
    return -(-x // m) * m


def _pick_block(dim, cap, align):
    """Full dim if it fits under `cap`, else the largest `align`-aligned block."""
    if dim <= cap:
        return dim
    return max(align, (cap // align) * align)


def _tpu_budgets():
    """(x-tile byte budget, vmem_limit_bytes), derived from physical VMEM."""
    try:
        vmem_cap = int(pltpu.get_tpu_info().vmem_capacity_bytes)
    except Exception:
        vmem_cap = 64 * 1024 * 1024  # conservative (v7x-sized) fallback
    # Default double-buffering => footprint ~4x the x tile (in + out, 2 bufs
    # each) plus small side inputs. Keep the tile at ~1/10 of physical VMEM,
    # capped at 8 MiB (already >85%-of-roofline regime).
    tile_budget = min(8 * 1024 * 1024, vmem_cap // 10)
    vmem_limit = min(vmem_cap * 3 // 4, max(6 * tile_budget, 32 * 1024 * 1024))
    return tile_budget, int(vmem_limit)


def _run(kernel, x2, ss, ss_spec, br, bc, vmem_limit):
    rows, cols = x2.shape
    grid = (pl.cdiv(rows, br), pl.cdiv(cols, bc))
    return pl.pallas_call(
        kernel,
        out_shape=jax.ShapeDtypeStruct((rows, cols), x2.dtype),
        grid=grid,
        in_specs=[
            ss_spec,
            pl.BlockSpec((br, bc), lambda r, c: (r, c)),
        ],
        out_specs=pl.BlockSpec((br, bc), lambda r, c: (r, c)),
        compiler_params=pltpu.CompilerParams(
            dimension_semantics=("parallel", "parallel"),
            vmem_limit_bytes=vmem_limit,
        ),
    )(ss, x2)


# --------------------------------------------------------------------------
# Public wrapper
# --------------------------------------------------------------------------
def frozen_batch_norm_2d(x, weight, bias, running_mean, running_var, eps=1e-5):
    """FrozenBatchNorm2d forward. x: (N, C, H, W); params: (C,). Returns NCHW."""
    N, C, H, W = x.shape
    HW = H * W

    # Fold the frozen affine into a single per-channel scale/shift (f32, O(C)).
    w = weight.astype(jnp.float32)
    b = bias.astype(jnp.float32)
    rm = running_mean.astype(jnp.float32)
    rv = running_var.astype(jnp.float32)
    scale = w * lax.rsqrt(rv + jnp.float32(eps))
    shift = b - rm * scale

    itemsize = jnp.dtype(x.dtype).itemsize
    sub_align = max(8, 32 // itemsize)  # 8 (f32), 16 (bf16), 32 (i8)
    tile_budget, vmem_limit = _tpu_budgets()

    if HW % 128 == 0:
        # --- Row path: (N*C, H*W); per-row scale/shift. Lane dim = H*W. ---
        rows, cols = N * C, HW
        x2 = x.reshape(rows, cols)
        ss = jnp.stack([jnp.tile(scale, N), jnp.tile(shift, N)], axis=1)  # (rows, 2)

        # Prefer full-row (contiguous) blocks; tile columns only for huge maps.
        if cols * itemsize * sub_align <= tile_budget:
            bc = cols
        else:
            bc = _pick_block(cols, max(128, tile_budget // (sub_align * itemsize)), 128)
        max_rows_fit = max(sub_align, tile_budget // max(1, bc * itemsize))
        br = _pick_block(rows, max_rows_fit, sub_align)

        # Keep >= 2 row blocks when possible so both v7x TensorCores get work.
        if -(-rows // br) < 2 and rows >= 2 * sub_align:
            br = min(br, _round_up(-(-rows // 2), sub_align))

        ss_spec = pl.BlockSpec((br, 2), lambda r, c: (r, 0))
        out2 = _run(_bn_row_kernel, x2, ss, ss_spec, br, bc, vmem_limit)
        return out2.reshape(N, C, H, W)

    # --- Lane path (H*W not a multiple of 128, e.g. 7x7 / 14x14 maps): ---
    # flatten to (N, C*H*W) so the lane dim stays large & dense; scale/shift
    # become per-lane tables of shape (2, C*H*W).
    rows, cols = N, C * HW
    x2 = x.reshape(rows, cols)
    ss = jnp.stack([jnp.repeat(scale, HW), jnp.repeat(shift, HW)], axis=0)  # (2, cols)

    br = rows if rows <= sub_align else _pick_block(rows, sub_align, sub_align)
    bc = _pick_block(cols, max(128, tile_budget // max(1, br * itemsize)), 128)

    # Keep >= 2 column blocks when possible (dual-TC chips).
    if -(-cols // bc) < 2 and cols >= 2 * 128:
        bc = min(bc, _round_up(-(-cols // 2), 128))

    ss_spec = pl.BlockSpec((2, bc), lambda r, c: (0, c))
    out2 = _run(_bn_lane_kernel, x2, ss, ss_spec, br, bc, vmem_limit)
    return out2.reshape(N, C, H, W)


# --------------------------------------------------------------------------
# Reference + self-test
# --------------------------------------------------------------------------
def _reference(x, weight, bias, running_mean, running_var, eps=1e-5):
    w = weight.reshape(1, -1, 1, 1)
    b = bias.reshape(1, -1, 1, 1)
    rv = running_var.reshape(1, -1, 1, 1)
    rm = running_mean.reshape(1, -1, 1, 1)
    scale = w * lax.rsqrt(rv + eps)
    return x * scale + (b - rm * scale)


if __name__ == "__main__":
    key = jax.random.PRNGKey(0)
    kx, kw, kb, km, kv, kx2 = jax.random.split(key, 6)

    # Main path: H*W multiple of 128.
    N, C, H, W = 2, 4, 16, 16
    x = jax.random.normal(kx, (N, C, H, W), dtype=jnp.float32)
    weight = 1.0 + 0.1 * jax.random.normal(kw, (C,), dtype=jnp.float32)
    bias = 0.1 * jax.random.normal(kb, (C,), dtype=jnp.float32)
    running_mean = 0.5 * jax.random.normal(km, (C,), dtype=jnp.float32)
    running_var = jnp.abs(jax.random.normal(kv, (C,), dtype=jnp.float32)) + 0.5

    out = frozen_batch_norm_2d(x, weight, bias, running_mean, running_var)
    out = jax.block_until_ready(out)
    ref = _reference(x, weight, bias, running_mean, running_var)
    assert out.shape == (N, C, H, W)
    assert out.dtype == x.dtype
    assert jnp.allclose(out, ref, atol=1e-5, rtol=1e-5)

    # bf16 path (halves HBM traffic; compute in f32, cast once on store).
    x_bf16 = x.astype(jnp.bfloat16)
    out_bf16 = frozen_batch_norm_2d(x_bf16, weight, bias, running_mean, running_var)
    out_bf16 = jax.block_until_ready(out_bf16)
    ref_bf16 = _reference(
        x_bf16.astype(jnp.float32), weight, bias, running_mean, running_var
    ).astype(jnp.bfloat16)
    assert out_bf16.dtype == jnp.bfloat16
    assert jnp.allclose(
        out_bf16.astype(jnp.float32), ref_bf16.astype(jnp.float32),
        atol=2e-2, rtol=2e-2,
    )

    # Lane path: H*W not a multiple of 128 (typical late-stage CNN map 7x7).
    C2, H2, W2 = 8, 7, 7
    weight2 = 1.0 + 0.1 * jax.random.normal(kw, (C2,), dtype=jnp.float32)
    bias2 = 0.1 * jax.random.normal(kb, (C2,), dtype=jnp.float32)
    rm2 = 0.5 * jax.random.normal(km, (C2,), dtype=jnp.float32)
    rv2 = jnp.abs(jax.random.normal(kv, (C2,), dtype=jnp.float32)) + 0.5
    x_odd = jax.random.normal(kx2, (N, C2, H2, W2), dtype=jnp.float32)

    out_odd = frozen_batch_norm_2d(x_odd, weight2, bias2, rm2, rv2)
    out_odd = jax.block_until_ready(out_odd)
    ref_odd = _reference(x_odd, weight2, bias2, rm2, rv2)
    assert out_odd.shape == (N, C2, H2, W2)
    assert jnp.allclose(out_odd, ref_odd, atol=1e-5, rtol=1e-5)

    print("KERNEL_OK")
</pallas_src>

<mosaic_0001>
module attributes {stable_mosaic.version = 11 : i64} {
  func.func @_bn_row_kernel(%arg0: i32, %arg1: i32, %arg2: memref<8x2xf32, #tpu.memory_space<vmem>>, %arg3: memref<8x256xf32, #tpu.memory_space<vmem>>, %arg4: memref<8x256xf32, #tpu.memory_space<vmem>>) attributes {dimension_semantics = [#tpu.dimension_semantics<parallel>, #tpu.dimension_semantics<parallel>], iteration_bounds = array<i64: 1, 1>, scalar_prefetch = 0 : i64, scratch_operands = 0 : i64, tpu.core_type = #tpu.core_type<tc>, window_params = [{transform_indices = @transform_0, window_bounds = array<i64: 8, 2>}, {transform_indices = @transform_1, window_bounds = array<i64: 8, 256>}, {transform_indices = @transform_2, window_bounds = array<i64: 8, 256>}]} {
    %c0 = arith.constant 0 : index
    %c0_0 = arith.constant 0 : index
    %0 = vector.load %arg3[%c0, %c0_0] : memref<8x256xf32, #tpu.memory_space<vmem>>, vector<8x256xf32>
    %c0_1 = arith.constant 0 : index
    %c0_2 = arith.constant 0 : index
    %1 = vector.load %arg2[%c0_1, %c0_2] : memref<8x2xf32, #tpu.memory_space<vmem>>, vector<8x1xf32>
    %c0_3 = arith.constant 0 : index
    %c1 = arith.constant 1 : index
    %2 = vector.load %arg2[%c0_3, %c1] : memref<8x2xf32, #tpu.memory_space<vmem>>, vector<8x1xf32>
    %3 = vector.broadcast %1 : vector<8x1xf32> to vector<8x256xf32>
    %4 = arith.mulf %0, %3 : vector<8x256xf32>
    %5 = vector.broadcast %2 : vector<8x1xf32> to vector<8x256xf32>
    %6 = arith.addf %4, %5 : vector<8x256xf32>
    %c0_4 = arith.constant 0 : index
    %c0_5 = arith.constant 0 : index
    %7 = vector.load %arg4[%c0_4, %c0_5] : memref<8x256xf32, #tpu.memory_space<vmem>>, vector<8x256xf32>
    tpu.vector_store %arg4[%c0_4, %c0_5], %6 {strides = array<i32>} : memref<8x256xf32, #tpu.memory_space<vmem>>, vector<8x256xf32>,
    return
  }
  func.func @transform_0(%arg0: i32, %arg1: i32) -> (i32, i32) {
    %c0_i32 = arith.constant 0 : i32
    %c0_i32_0 = arith.constant 0 : i32
    return %arg0, %c0_i32 : i32, i32
  }
  func.func @transform_1(%arg0: i32, %arg1: i32) -> (i32, i32) {
    %c0_i32 = arith.constant 0 : i32
    return %arg0, %arg1 : i32, i32
  }
  func.func @transform_2(%arg0: i32, %arg1: i32) -> (i32, i32) {
    %c0_i32 = arith.constant 0 : i32
    return %arg0, %arg1 : i32, i32
  }
}

</mosaic_0001>

<bundles_post_ra>
// kernel: tpu_custom_call.1
= control target key start
LH: loop header
LB: loop body
LE: loop exit
PB: predicated region body
PF: predicated region fallthrough
CT: control target
= control target key end

     0   :  { %7 = vsyncpa [#allocation3], 0  ;;  %s157_s0 = inlined_call_operand.vmem [shape: f32[8,2], index: 0, kind: input, shape index: {}]   ;;  %s158_s1 = inlined_call_operand.hbm [shape: f32[8,256], index: 1, kind: input, shape index: {}]   ;;  %s159_s2 = inlined_call_operand.hbm [shape: f32[8,256], index: 2, kind: output, shape index: {}]  }
   0x1   :  { %8 = vsyncpa [#allocation4], 0  ;;  %s111_s9 = smov [#allocation2]   ;;  %s63_s13 = scalar_lea.hbm %s158_s1, 256 }
   0x2   :  { %s17_s10 = sshll.u32 %s111_s9, 4  ;;  %p64_p0 = scmp.ne.s32.totalorder %s158_s1, %s63_s13  ;;  %s18_s10 = int_to_ptr.vmem [resolvable:$true] %s17_s10 }
   0x3   :  { %p67_p1 = scmp.lt.u32.totalorder %s63_s13, %s158_s1 }
   0x5   :  { %p69_p2 = pnand %p67_p1, %p64_p0 }
   0x7   :  { %72 = shalt.err (!%p69_p2)
}
   0x8   :  { %s73_s18 = scalar_lea.vmem %s18_s10, 256  ;;  %p78_p4 = scmp.lt.s32.totalorder %s18_s10, %s18_s10 }
   0x9   :  { %p74_p3 = scmp.ne.s32.totalorder %s18_s10, %s73_s18  ;;  %p79_p5 = scmp.lt.s32.totalorder %s73_s18, %s73_s18 }
   0xb   :  { %p80_p6 = por %p79_p5, %p78_p4 }
   0xd   :  { %p81_p7 = pnand %p80_p6, %p74_p3 }
   0xf   :  { %84 = shalt.err (!%p81_p7)
}
  0x10   :  { %20 = dma.hbm_to_vmem [thread:$0]  %s158_s1, 256, %s18_s10, [#allocation3]  }
  0x11   :  { %107 = dma.done.wait [#allocation3], 256  }
  0x12   :  { %108 = vsyncadd [#allocation3], 4294967040  ;;  %v112_v0 = vmov 0   ;;  %v26_v1 = vld [vmem:[%s157_s0] sm:$0xff]  ;;  %v113_v2 = vmov 1   ;;  %v25_v5 = vld [vmem:[#allocation2 + $0x8] sm:$0xff] }
  0x13   :  { %61 = vset.pattern.permute.xlu0 %v112_v0  ;;  %v24_v4 = vld [vmem:[#allocation2] sm:$0xff]  ;;  %s114_s23 = smov [#allocation5]  }
  0x14   :  { %29 = vperm.xlu0 %61, %v26_v1   ;;  %s48_s24 = sshll.u32 %s114_s23, 4  ;;  %s49_s24 = int_to_ptr.vmem [resolvable:$true] %s48_s24 }
  0x15   :  { %s85_s1 = scalar_lea.vmem %s49_s24, 256  ;;  %p90_p9 = scmp.lt.s32.totalorder %s49_s24, %s49_s24 }
  0x16   :  { %p86_p8 = scmp.ne.s32.totalorder %s49_s24, %s85_s1  ;;  %p91_p10 = scmp.lt.s32.totalorder %s85_s1, %s85_s1 }
  0x18   :  { %62 = vset.pattern.permute.xlu0 %v113_v2  ;;  %p92_p11 = por %p91_p10, %p90_p9 }
  0x19   :  { %35 = vperm.xlu0 %62, %v26_v1  }
  0x1a   :  { %p93_p12 = pnand %p92_p11, %p86_p8 }
  0x93   :  { %v30_v3 = vpop.permute.xlu0 %29 }
  0x94   :  { %v32_v6 = vmul.f32 %v30_v3, %v24_v4  ;;  %v33_v7 = vmul.f32 %v30_v3, %v25_v5 }
  0x98   :  { %v36_v8 = vpop.permute.xlu0 %35 }
  0x99   :  { %v38_v9 = vadd.f32 %v36_v8, %v32_v6  ;;  %v39_v10 = vadd.f32 %v36_v8, %v33_v7 }
  0x9b   :  { %40 = vst [vmem:[#allocation5] sm:$0xff] %v38_v9  ;;  %41 = vst [vmem:[#allocation5 + $0x8] sm:$0xff] %v39_v10 }
  0x9c   :  { %96 = shalt.err (!%p93_p12)
}
  0x9d   :  { %s97_s26 = scalar_lea.hbm %s159_s2, 256 }
  0x9e   :  { %p98_p13 = scmp.ne.s32.totalorder %s159_s2, %s97_s26  ;;  %p101_p0 = scmp.lt.u32.totalorder %s97_s26, %s159_s2 }
  0xa0   :  { %p103_p1 = pnand %p101_p0, %p98_p13 }
  0xa2   :  { %106 = shalt.err (!%p103_p1)
}
  0xa3   :  { %51 = dma.vmem_to_hbm [thread:$0]  %s49_s24, 256, %s159_s2, [#allocation4]  }
  0xa4   :  { %109 = dma.done.wait [#allocation4], 256  }
  0xa5   :  { %110 = vsyncadd [#allocation4], 4294967040 }
  0xa6   :  { %55 = vsyncpa [#allocation3], 1 }
  0xa7   :  { %56 = vsyncpa [#allocation4], 1 }

</bundles_post_ra>
